<compile_context>
chip_gen: v5e
topology: v5e:2x2
jax: 0.10.0
libtpu: 0.0.40
codegen_flags: <defaults>
</compile_context>

<pallas_src>
import math
import functools

import jax
import jax.numpy as jnp
from jax.experimental import pallas as pl
from jax.experimental.pallas import tpu as pltpu


def _round_up(v, m):
    return ((v + m - 1) // m) * m


def _vmem_capacity_bytes():
    """Per-core VMEM capacity; conservative fallback if the query fails."""
    try:
        return int(pltpu.get_tpu_info().vmem_capacity_bytes)
    except Exception:
        return 64 << 20  # v7x per-TensorCore capacity (smallest of v5e/v6e/v7x)


def _main_vmem_bytes(tm, tk, fp, skip_connect, out_itemsize):
    """Full VMEM footprint of the aggregation kernel for one tile choice."""
    need = 2 * tm * tk * 2               # adj tile, bf16, double-buffered
    need += 2 * tk * fp * 2              # support tile, bf16, double-buffered
    need += 2 * 8 * fp * 4               # bias row (sublane-padded), f32
    if skip_connect:
        need += 2 * tm * fp * 4          # f32 skip-connection tile
    need += 2 * tm * fp * out_itemsize   # output tile, double-buffered
    need += tm * fp * 4                  # f32 accumulator scratch
    return need


def _pick_main_tiles(np0, fp, skip_connect, out_itemsize, budget):
    """Largest (row tile, K tile) fitting the VMEM budget; prefers big rows."""
    for tm in (512, 256, 128):
        if tm > np0:
            continue
        for tk in (512, 256, 128):
            if tk > np0:
                continue
            if _main_vmem_bytes(tm, tk, fp, skip_connect, out_itemsize) <= budget:
                return tm, tk
    return 128, 128


def _support_vmem_bytes(tms, dp, fp):
    return 2 * tms * dp * 2 + 2 * dp * fp * 2 + 2 * tms * fp * 2


def _pick_support_tile(max_tile, dp, fp, budget):
    for tms in (512, 256, 128):
        if tms > max_tile:
            continue
        if _support_vmem_bytes(tms, dp, fp) <= budget:
            return tms
    return 128


# --------------------------------------------------------------------------
# Kernels
# --------------------------------------------------------------------------
def _support_kernel(x_ref, w_ref, o_ref):
    # support = x @ W   (bf16 operands, f32 accumulation, bf16 store)
    o_ref[0] = jnp.dot(x_ref[0], w_ref[...],
                       preferred_element_type=jnp.float32).astype(o_ref.dtype)


def _aggregate_kernel(*refs, skip_connect):
    # out = adj @ support [+ bias] [+ x]   (K-tiled contraction over nodes)
    if skip_connect:
        adj_ref, sup_ref, b_ref, xs_ref, o_ref, acc_ref = refs
    else:
        adj_ref, sup_ref, b_ref, o_ref, acc_ref = refs
        xs_ref = None
    k = pl.program_id(2)

    @pl.when(k == 0)
    def _():
        acc_ref[...] = jnp.zeros_like(acc_ref)

    acc_ref[...] += jnp.dot(adj_ref[0], sup_ref[0],
                            preferred_element_type=jnp.float32)

    @pl.when(k == pl.num_programs(2) - 1)
    def _():
        out = acc_ref[...] + b_ref[...]        # f32 epilogue: bias broadcast
        if skip_connect:
            out = out + xs_ref[0]              # f32 residual (full precision)
        o_ref[0] = out.astype(o_ref.dtype)


# --------------------------------------------------------------------------
# Wrapper
# --------------------------------------------------------------------------
def graph_convolution(x, adj, weight, bias=None, skip_connect=False):
    """Pallas equivalent of GraphConvolution.forward.

    x      : (B, N, D) float32
    adj    : (B, N, N) float32
    weight : (D, F)    float32
    bias   : (F,) or None
    """
    B, N, D = x.shape
    Dw, F = weight.shape
    assert Dw == D
    assert adj.shape == (B, N, N)
    if skip_connect:
        assert D == F, "skip_connect requires in_feats_dim == out_feats_dim"

    out_dtype = x.dtype
    compute_dtype = jnp.bfloat16
    out_itemsize = jnp.dtype(out_dtype).itemsize

    Np0 = _round_up(N, 128)
    Dp = _round_up(D, 128)
    Fp = _round_up(F, 128)

    cap = _vmem_capacity_bytes()
    budget = int(cap * 0.45)   # leave headroom for compiler-internal scratch

    TM, TK = _pick_main_tiles(Np0, Fp, skip_connect, out_itemsize, budget)
    Np = _round_up(N, max(TM, TK))   # pad nodes so both tiles divide evenly
    J = Np // TM
    K = Np // TK

    # --- stage 1: support = x @ W (hoisted small kernel, bf16 output) ------
    x_p = jnp.pad(x, ((0, 0), (0, Np - N), (0, Dp - D))).astype(compute_dtype)
    w_p = jnp.pad(weight, ((0, Dp - D), (0, Fp - F))).astype(compute_dtype)

    TMs = _pick_support_tile(max(TM, TK), Dp, Fp, budget)
    Js = Np // TMs
    sup_need = _support_vmem_bytes(TMs, Dp, Fp)
    sup_vmem_limit = int(min(cap, max(sup_need + (8 << 20), 32 << 20)))

    support = pl.pallas_call(
        _support_kernel,
        out_shape=jax.ShapeDtypeStruct((B, Np, Fp), compute_dtype),
        grid_spec=pltpu.PrefetchScalarGridSpec(
            num_scalar_prefetch=0,
            grid=(B, Js),
            in_specs=[pl.BlockSpec((1, TMs, Dp), lambda b, j: (b, j, 0)),
                      pl.BlockSpec((Dp, Fp), lambda b, j: (0, 0))],
            out_specs=pl.BlockSpec((1, TMs, Fp), lambda b, j: (b, j, 0)),
        ),
        compiler_params=pltpu.CompilerParams(
            dimension_semantics=("parallel", "parallel"),
            vmem_limit_bytes=sup_vmem_limit),
        cost_estimate=pl.CostEstimate(
            flops=int(2.0 * B * Np * Dp * Fp), transcendentals=0,
            bytes_accessed=int(x_p.size * 2 + w_p.size * 2 + B * Np * Fp * 2)),
    )(x_p, w_p)

    # --- stage 2: out = adj @ support [+ bias] [+ x] ------------------------
    adj_p = jnp.pad(adj, ((0, 0), (0, Np - N), (0, Np - N))).astype(compute_dtype)
    if bias is None:
        # Zero bias keeps a single kernel; numerically identical to no bias.
        b_p = jnp.zeros((1, Fp), jnp.float32)
    else:
        b_p = jnp.pad(bias.astype(jnp.float32), (0, Fp - F)).reshape(1, Fp)

    in_specs = [
        pl.BlockSpec((1, TM, TK), lambda b, j, k: (b, j, k)),   # adj tiles
        pl.BlockSpec((1, TK, Fp), lambda b, j, k: (b, k, 0)),   # support tiles
        pl.BlockSpec((1, Fp), lambda b, j, k: (0, 0)),          # bias (resident)
    ]
    inputs = [adj_p, support, b_p]
    if skip_connect:
        # Residual streamed in f32 so the add matches PyTorch precision.
        x_skip = jnp.pad(x, ((0, 0), (0, Np - N), (0, Fp - F))).astype(jnp.float32)
        in_specs.append(pl.BlockSpec((1, TM, Fp), lambda b, j, k: (b, j, 0)))
        inputs.append(x_skip)

    main_need = _main_vmem_bytes(TM, TK, Fp, skip_connect, out_itemsize)
    main_vmem_limit = int(min(cap, max(main_need + (8 << 20), 32 << 20)))

    flops = 2.0 * B * Np * Np * Fp
    bytes_accessed = (adj_p.size * 2 + B * J * Np * Fp * 2
                      + (B * Np * Fp * 4 if skip_connect else 0)
                      + B * Np * Fp * out_itemsize)

    out_p = pl.pallas_call(
        functools.partial(_aggregate_kernel, skip_connect=skip_connect),
        out_shape=jax.ShapeDtypeStruct((B, Np, Fp), out_dtype),
        grid_spec=pltpu.PrefetchScalarGridSpec(
            num_scalar_prefetch=0,
            grid=(B, J, K),
            in_specs=in_specs,
            out_specs=pl.BlockSpec((1, TM, Fp), lambda b, j, k: (b, j, 0)),
            scratch_shapes=[pltpu.VMEM((TM, Fp), jnp.float32)],
        ),
        compiler_params=pltpu.CompilerParams(
            # batch and row-tile axes are independent (megacore-shardable even
            # at B == 1); the K (contraction) axis is sequential.
            dimension_semantics=("parallel", "parallel", "arbitrary"),
            vmem_limit_bytes=main_vmem_limit),
        cost_estimate=pl.CostEstimate(
            flops=int(flops), transcendentals=0,
            bytes_accessed=int(bytes_accessed)),
    )(*inputs)

    return out_p[:, :N, :F]


def init_gcn_params(key, in_feats_dim, out_feats_dim, bias=True):
    """Mirrors GraphConvolution.reset_parameters:
    weight <- xavier_uniform, bias <- U(-1/sqrt(out_feats), 1/sqrt(out_feats))."""
    kw, kb = jax.random.split(key)
    a = math.sqrt(6.0 / (in_feats_dim + out_feats_dim))
    weight = jax.random.uniform(
        kw, (in_feats_dim, out_feats_dim), jnp.float32, minval=-a, maxval=a)
    if bias:
        stdv = 1.0 / math.sqrt(out_feats_dim)
        b = jax.random.uniform(
            kb, (out_feats_dim,), jnp.float32, minval=-stdv, maxval=stdv)
    else:
        b = None
    return weight, b


if __name__ == "__main__":
    # Small deterministic example: B=2, N=16 nodes, D=F=32 features
    # (equal so that skip_connect can be exercised).
    B, N, D, F = 2, 16, 32, 32
    key = jax.random.PRNGKey(0)
    kx, kadj, kparams = jax.random.split(key, 3)

    x = jax.random.normal(kx, (B, N, D), jnp.float32)
    # Symmetric, row-normalized adjacency with self loops.
    raw = jax.random.uniform(kadj, (B, N, N), jnp.float32)
    adj = (raw + jnp.swapaxes(raw, 1, 2)) * 0.5 + jnp.eye(N)[None]
    adj = adj / jnp.sum(adj, axis=-1, keepdims=True)

    weight, bias = init_gcn_params(kparams, D, F, bias=True)

    out = graph_convolution(x, adj, weight, bias, skip_connect=True)
    out = jax.block_until_ready(out)

    # Reference in plain JAX (same math as the PyTorch forward, f32).
    ref = jnp.matmul(adj, jnp.matmul(x, weight)) + bias + x
    assert out.shape == (B, N, F)
    # bf16 operands with f32 accumulation -> looser tolerance than pure f32.
    assert jnp.allclose(out, ref, atol=3e-2, rtol=3e-2), \
        float(jnp.max(jnp.abs(out - ref)))

    # Second path: no bias, no skip, D != F (exercises output padding).
    F2 = 48
    w2, _ = init_gcn_params(kparams, D, F2, bias=False)
    out2 = graph_convolution(x, adj, w2, bias=None, skip_connect=False)
    out2 = jax.block_until_ready(out2)
    ref2 = jnp.matmul(adj, jnp.matmul(x, w2))
    assert out2.shape == (B, N, F2)
    assert jnp.allclose(out2, ref2, atol=3e-2, rtol=3e-2), \
        float(jnp.max(jnp.abs(out2 - ref2)))

    print("KERNEL_OK")
</pallas_src>

<mosaic_0001>
module attributes {stable_mosaic.version = 11 : i64} {
  func.func @_support_kernel(%arg0: i32, %arg1: i32, %arg2: memref<1x128x128xbf16, #tpu.memory_space<vmem>>, %arg3: memref<128x128xbf16, #tpu.memory_space<vmem>>, %arg4: memref<1x128x128xbf16, #tpu.memory_space<vmem>>) attributes {dimension_semantics = [#tpu.dimension_semantics<parallel>, #tpu.dimension_semantics<parallel>], iteration_bounds = array<i64: 2, 1>, scalar_prefetch = 0 : i64, scratch_operands = 0 : i64, tpu.core_type = #tpu.core_type<tc>, window_params = [{transform_indices = @transform_0, window_bounds = array<i64: 1, 128, 128>}, {pipeline_mode = #tpu.pipeline_mode<synchronous>, transform_indices = @transform_1, window_bounds = array<i64: 128, 128>}, {transform_indices = @transform_2, window_bounds = array<i64: 1, 128, 128>}]} {
    %c0 = arith.constant 0 : index
    %c0_0 = arith.constant 0 : index
    %c0_1 = arith.constant 0 : index
    %0 = vector.load %arg2[%c0, %c0_0, %c0_1] : memref<1x128x128xbf16, #tpu.memory_space<vmem>>, vector<1x128x128xbf16>
    %1 = vector.shape_cast %0 : vector<1x128x128xbf16> to vector<128x128xbf16>
    %c0_2 = arith.constant 0 : index
    %c0_3 = arith.constant 0 : index
    %2 = vector.load %arg3[%c0_2, %c0_3] : memref<128x128xbf16, #tpu.memory_space<vmem>>, vector<128x128xbf16>
    %cst = arith.constant dense<0.000000e+00> : vector<128x128xf32>
    %3 = tpu.matmul %1, %2, %cst {dimension_numbers = #tpu.dot_dimension_numbers<[1], [0], [0], [1], [0, 0, 1, 1], [], []>} : vector<128x128xbf16>, vector<128x128xbf16>, vector<128x128xf32> -> vector<128x128xf32>
    %4 = arith.truncf %3 : vector<128x128xf32> to vector<128x128xbf16>
    %c0_4 = arith.constant 0 : index
    %c0_5 = arith.constant 0 : index
    %c0_6 = arith.constant 0 : index
    %5 = vector.load %arg4[%c0_4, %c0_5, %c0_6] : memref<1x128x128xbf16, #tpu.memory_space<vmem>>, vector<1x128x128xbf16>
    %6 = vector.shape_cast %5 : vector<1x128x128xbf16> to vector<128x128xbf16>
    %7 = vector.shape_cast %4 : vector<128x128xbf16> to vector<1x128x128xbf16>
    tpu.vector_store %arg4[%c0_4, %c0_5, %c0_6], %7 {strides = array<i32>} : memref<1x128x128xbf16, #tpu.memory_space<vmem>>, vector<1x128x128xbf16>,
    return
  }
  func.func @transform_0(%arg0: i32, %arg1: i32) -> (i32, i32, i32) {
    %c0_i32 = arith.constant 0 : i32
    %c0_i32_0 = arith.constant 0 : i32
    return %arg0, %arg1, %c0_i32 : i32, i32, i32
  }
  func.func @transform_1(%arg0: i32, %arg1: i32) -> (i32, i32) {
    %c0_i32 = arith.constant 0 : i32
    %c0_i32_0 = arith.constant 0 : i32
    %c0_i32_1 = arith.constant 0 : i32
    return %c0_i32, %c0_i32_0 : i32, i32
  }
  func.func @transform_2(%arg0: i32, %arg1: i32) -> (i32, i32, i32) {
    %c0_i32 = arith.constant 0 : i32
    %c0_i32_0 = arith.constant 0 : i32
    return %arg0, %arg1, %c0_i32 : i32, i32, i32
  }
}

</mosaic_0001>

<bundles_post_ra>
// kernel: tpu_custom_call.1
= control target key start
LH: loop header
LB: loop body
LE: loop exit
PB: predicated region body
PF: predicated region fallthrough
CT: control target
= control target key end

     0   :  { %7 = vsyncpa [#allocation3], 0  ;;  %s1109_s0 = inlined_call_operand.hbm [shape: bf16[2,128,128], index: 0, kind: input, shape index: {}]   ;;  %s1110_s1 = inlined_call_operand.hbm [shape: bf16[128,128], index: 1, kind: input, shape index: {}]   ;;  %s1111_s2 = inlined_call_operand.hbm [shape: bf16[2,128,128], index: 2, kind: output, shape index: {}]  }
   0x1   :  { %9 = vsyncpa [#allocation3 + $0x1], 0 }
   0x2   :  { %10 = vsyncpa [#allocation6], 0 }
   0x3   :  { %11 = vsyncpa [#allocation4], 0 }
   0x4   :  { %13 = vsyncpa [#allocation4 + $0x1], 0  ;;  %s940_s9 = smov 0   ;;  %s942_s10 = smov 0  }
   0x5   :  { %s944_s11 = smov 0   ;;  %s946_s12 = smov 0  }
   0x6   :  { %s948_s13 = smov 0   ;;  %s950_s14 = smov 0  }
   0x7 LB: > { %s525_s15 = sadd.s32 4294967295, %s918_s14   ;;  %s526_s16 = sadd.s32 4294967294, %s918_s14   ;;  %s918_s14 = sphi %s950_s14, %s19_s14   ;;  %s914_s13 = sphi %s948_s13, %s1123_s13   ;;  %s910_s12 = sphi %s946_s12, %s1122_s12   ;;  %s906_s11 = sphi %s944_s11, %s1121_s11   ;;  %s902_s10 = sphi %s942_s10, %s1120_s10   ;;  %s898_s9 = sphi %s940_s9, %s1119_s9  }
   0x8   : > { %p53_p0 = scmp.ne.s32.totalorder %s902_s10, %s898_s9  ;;  %p974_p1 = scmp.eq.s32.totalorder %s525_s15, 0 }
   0x9   : > { %p978_p2 = scmp.eq.s32.totalorder %s525_s15, 1  ;;  %p106_p3 = scmp.eq.s32.totalorder %s526_s16, 1 }
   0xa   : > { %p984_p4 = por %p974_p1, %p53_p0  ;;  %p527_p5 = scmp.ge.s32.totalorder %s918_s14, 1 }
   0xb   : > { %p989_p6 = por %p106_p3, %p53_p0  ;;  %p113_p7 = scmp.lt.s32.totalorder %s918_s14, 3 }
   0xc   : > { %s124_s23 = sshll.u32 %s1110_s1, 4  ;;  %s920_s25 = smov [#allocation5]   ;;  %s125_s23 = int_to_ptr.hbm [resolvable:$true] %s124_s23 }
   0xd   : > { %p997_p8 = pnand %p527_p5, %p113_p7  ;;  %s126_s26 = sshll.u32 %s920_s25, 4  ;;  %s127_s26 = int_to_ptr.vmem [resolvable:$true] %s126_s26 }
   0xe   : > { %p529_p11 = scmp.ge.s32.totalorder %s918_s14, 2  ;;  %s921_s27 = smov 64  }
   0xf   : > { %p703_p9 = pneg %p997_p8  ;;  %s922_s28 = smov 4  }
  0x10   : > { %s31_s29 = sadd.s32 1, %s914_s13  ;;  %s40_s30 = sadd.s32 1, %s906_s11 }
  0x11   : > { %p704_p10 = pnand %p703_p9, %p974_p1  ;;  %p33_p12 = scmp.ge.s32.totalorder %s31_s29, 2 }
  0x12   : > { %p47_p13 = scmp.ne.s32.totalorder %s906_s11, %s902_s10  ;;  %p48_p0 = scmp.eq.s32.totalorder %s918_s14, 0 }
  0x13   : > { %706 = dma.hbm_to_vmem [thread:$0]  (!%p704_p10), %s125_s23, 1024, %s127_s26, [#allocation6], %s921_s27, %s921_s27, %s922_s28  }
  0x14   : > { %s1125_s29 = smov (%p33_p12, %s31_s29), 0  ;;  %p1016_p3 = por %p48_p0, %p47_p13 }
  0x15   : > { %p1022_p5 = por %p978_p2, %p47_p13  ;;  %s35_s5 = ssub.s32 %s914_s13, %s1125_s29 }
  0x16   : > { %p716_p7 = scmp.lt.s32.totalorder %s918_s14, 2  ;;  %p38_p9 = scmp.eq.s32.totalorder %s35_s5, 0 }
  0x17   : > { %s140_s6 = sand.u32 1, %s906_s11   ;;  %s606_s15 = sshll.u32 %s914_s13, 6 }
  0x18   : > { %s530_s7 = sshll.u32 %s140_s6, 6  ;;  %s151_s22 = scalar_lea.hbm %s1109_s0, %s606_s15 }
  0x19   : > { %s1031_s8 = scalar_select %p38_p9, %s906_s11, %s40_s30  }
  0x1a   : > { %s144_s23 = scalar_lea.vmem [#allocation2], %s530_s7  ;;  %s152_s18 = sshll.u32 %s151_s22, 4  ;;  %s153_s18 = int_to_ptr.hbm [resolvable:$true] %s152_s18 }
  0x1b   : > { %s154_s25 = sshll.u32 %s144_s23, 4  ;;  %p708_p2 = pnand %p716_p7, %p1016_p3  ;;  %s155_s25 = int_to_ptr.vmem [resolvable:$true] %s154_s25 }
  0x1c   : > { %s141_s26 = scalar_lea.sflag [#allocation3], %s140_s6  ;;  %166 = sbr.rel (%p997_p8) target bundleno = 232 (0xe8), region = 28 }
  0x1d   : > { %710 = dma.hbm_to_vmem [thread:$0]  (!%p708_p2), %s153_s18, 1024, %s155_s25, %s141_s26, %s921_s27, %s921_s27, %s922_s28  }
  0x1e   : > { %s1045_s30 = sand.u32 (!%p997_p8), 1, %s902_s10  }
  0x1f   : > { %s534_s5 = sshll.u32 (!%p997_p8), %s1045_s30, 6  ;;  %s169_s7 = scalar_lea.sflag (!%p997_p8), [#allocation3], %s1045_s30 }
  0x20   : > { %s1051_s3 = scalar_lea.vmem (!%p997_p8), [#allocation2], %s534_s5 }
  0x21   : > { %885 = dma.done.wait (%p984_p4), %s169_s7, 1024  }
  0x22   : > { %887 = vsyncadd (%p984_p4), %s169_s7, 4294966272 }
  0x23   : > { %889 = dma.done.wait (%p974_p1), [#allocation6], 1024  }
  0x24   : > { %891 = vsyncadd (%p974_p1), [#allocation6], 4294966272  ;;  %v622_v0 = vld [vmem:[#allocation5 + $0x38] sm:$0xff]  ;;  %v621_v1 = vld [vmem:[#allocation5 + $0x30] sm:$0xff]  ;;  %s198_s17 = scalar_lea.vmem [#allocation7], %s534_s5  ;;  %s623_s19 = sshll.u32 %s910_s12, 6 }
  0x25   : > { %329 = vmatpush.bf16.msra.mxu0 %v622_v0  ;;  %671 = vmatpush.bf16.msra.mxu1 %v622_v0  ;;  %v620_v2 = vld [vmem:[#allocation5 + $0x28] sm:$0xff]  ;;  %v619_v3 = vld [vmem:[#allocation5 + $0x20] sm:$0xff]  ;;  %v618_v4 = vld [vmem:[#allocation5 + $0x18] sm:$0xff]  ;;  %s424_s28 = scalar_lea.hbm %s1111_s2, %s623_s19  ;;  %s425_s6 = sshll.u32 %s198_s17, 4  ;;  %s426_s6 = int_to_ptr.vmem [resolvable:$true] %s425_s6 }
  0x26   : > { %672 = vmatpush.bf16.msra.mxu2 %v622_v0  ;;  %673 = vmatpush.bf16.msra.mxu3 %v622_v0  ;;  %v617_v5 = vld [vmem:[#allocation5 + $0x10] sm:$0xff]  ;;  %v616_v6 = vld [vmem:[#allocation5 + $0x8] sm:$0xff]  ;;  %v615_v7 = vld [vmem:[#allocation5] sm:$0xff]  ;;  %s427_s15 = sshll.u32 %s424_s28, 4  ;;  %s411_s12 = scalar_lea.sflag [#allocation4], %s1045_s30  ;;  %s428_s15 = int_to_ptr.hbm [resolvable:$true] %s427_s15 }
  0x27   : > { %v607_v8 = vld [vmem:[%s1051_s3] sm:$0xff]  ;;  %v609_v9 = vld [vmem:[%s1051_s3 + $0x10] sm:$0xff]  ;;  %v608_v12 = vld [vmem:[%s1051_s3 + $0x8] sm:$0xff]  ;;  %s846_s16 = sshra.s32 %s428_s15, 4  ;;  %s852_s25 = scalar_lea.hbm %s1111_s2, 128  ;;  %s847_s16 = int_to_ptr.hbm [resolvable:$true] %s846_s16 }
  0x28   : > { %v611_v10 = vld [vmem:[%s1051_s3 + $0x20] sm:$0xff]  ;;  %v613_v11 = vld [vmem:[%s1051_s3 + $0x30] sm:$0xff]  ;;  %v610_v13 = vld [vmem:[%s1051_s3 + $0x18] sm:$0xff]  ;;  %s848_s21 = scalar_lea.hbm %s847_s16, 64  ;;  %p853_p10 = scmp.lt.s32.totalorder %s847_s16, %s1111_s2 }
  0x29   : > { %330 = vmatpush.bf16.msra.mxu0 %v621_v1  ;;  %674 = vmatpush.bf16.msra.mxu1 %v621_v1  ;;  %v612_v14 = vld [vmem:[%s1051_s3 + $0x28] sm:$0xff]  ;;  %v614_v15 = vld [vmem:[%s1051_s3 + $0x38] sm:$0xff]  ;;  %p849_p1 = scmp.ne.s32.totalorder %s847_s16, %s848_s21  ;;  %p854_p12 = scmp.lt.s32.totalorder %s852_s25, %s848_s21 }
  0x2a   : > { %675 = vmatpush.bf16.msra.mxu2 %v621_v1  ;;  %676 = vmatpush.bf16.msra.mxu3 %v621_v1 }
  0x2b   : > { %p850_p4 = pnand %p849_p1, %p1022_p5  ;;  %p855_p13 = por %p854_p12, %p853_p10 }
  0x2d   : > { %331 = vmatpush.bf16.msra.mxu0 %v620_v2  ;;  %677 = vmatpush.bf16.msra.mxu1 %v620_v2  ;;  %p851_p8 = pneg %p850_p4 }
  0x2e   : > { %678 = vmatpush.bf16.msra.mxu2 %v620_v2  ;;  %679 = vmatpush.bf16.msra.mxu3 %v620_v2 }
  0x2f   : > { %p856_p0 = pnand %p855_p13, %p851_p8 }
  0x31   : > { %332 = vmatpush.bf16.msra.mxu0 %v619_v3  ;;  %680 = vmatpush.bf16.msra.mxu1 %v619_v3 }
  0x32   : > { %681 = vmatpush.bf16.msra.mxu2 %v619_v3  ;;  %682 = vmatpush.bf16.msra.mxu3 %v619_v3 }
  0x35   : > { %333 = vmatpush.bf16.msra.mxu0 %v618_v4  ;;  %683 = vmatpush.bf16.msra.mxu1 %v618_v4 }
  0x36   : > { %684 = vmatpush.bf16.msra.mxu2 %v618_v4  ;;  %685 = vmatpush.bf16.msra.mxu3 %v618_v4 }
  0x39   : > { %334 = vmatpush.bf16.msra.mxu0 %v617_v5  ;;  %686 = vmatpush.bf16.msra.mxu1 %v617_v5 }
  0x3a   : > { %687 = vmatpush.bf16.msra.mxu2 %v617_v5  ;;  %688 = vmatpush.bf16.msra.mxu3 %v617_v5 }
  0x3d   : > { %335 = vmatpush.bf16.msra.mxu0 %v616_v6  ;;  %689 = vmatpush.bf16.msra.mxu1 %v616_v6 }
  0x3e   : > { %690 = vmatpush.bf16.msra.mxu2 %v616_v6  ;;  %691 = vmatpush.bf16.msra.mxu3 %v616_v6 }
  0x41   : > { %336 = vmatpush.bf16.msra.mxu0 %v615_v7  ;;  %692 = vmatpush.bf16.msra.mxu1 %v615_v7 }
  0x42   : > { %693 = vmatpush.bf16.msra.mxu2 %v615_v7  ;;  %694 = vmatpush.bf16.msra.mxu3 %v615_v7 }
  0x44   : > { %337 = vmatmul.bf16.vlgmr.msra.gmra.mxu0 %v607_v8  ;;  %347 = vmatmul.bf16.vlgmr.msra.gmra.mxu1 %v609_v9 }
  0x45   : > { %357 = vmatmul.bf16.vlgmr.msra.gmra.mxu2 %v611_v10  ;;  %367 = vmatmul.bf16.vlgmr.msra.gmra.mxu3 %v613_v11 }
  0x54   : > { %342 = vmatmul.bf16.gmra.mxu0 %v608_v12  ;;  %352 = vmatmul.bf16.gmra.mxu1 %v610_v13 }
  0x55   : > { %362 = vmatmul.bf16.gmra.mxu2 %v612_v14  ;;  %372 = vmatmul.bf16.gmra.mxu3 %v614_v15 }
  0xc1   : > { %v338_v16 = vpop.f32.mrf.mxu0  ;;  %v348_v17 = vpop.f32.mrf.mxu1 }
  0xc8   : > { %v358_v18 = vpop.f32.mrf.mxu2  ;;  %v368_v19 = vpop.f32.mrf.mxu3 }
  0xc9   : > { %v340_v20 = vpop.f32.mrf.mxu0  ;;  %v350_v21 = vpop.f32.mrf.mxu1 }
  0xca   : > { %v627_v22 = vpack.c.bf16 %v340_v20, %v338_v16  ;;  %v637_v23 = vpack.c.bf16 %v350_v21, %v348_v17 }
  0xcc   : > { %628 = vst [vmem:[%s198_s17] sm:$0xff] %v627_v22  }
  0xcd   : > { %665 = vst [vmem:[%s198_s17 + $0x10] sm:$0xff] %v637_v23  }
  0xd0   : > { %v360_v24 = vpop.f32.mrf.mxu2  ;;  %v370_v25 = vpop.f32.mrf.mxu3 }
  0xd1   : > { %v647_v26 = vpack.c.bf16 %v360_v24, %v358_v18  ;;  %v657_v27 = vpack.c.bf16 %v370_v25, %v368_v19  ;;  %v343_v28 = vpop.f32.mrf.mxu0  ;;  %v353_v29 = vpop.f32.mrf.mxu1 }
  0xd3   : > { %667 = vst [vmem:[%s198_s17 + $0x20] sm:$0xff] %v647_v26  }
  0xd4   : > { %669 = vst [vmem:[%s198_s17 + $0x30] sm:$0xff] %v657_v27  }
  0xd8   : > { %v363_v30 = vpop.f32.mrf.mxu2  ;;  %v373_v31 = vpop.f32.mrf.mxu3 }
  0xd9   : > { %v345_v32 = vpop.f32.mrf.mxu0  ;;  %v355_v33 = vpop.f32.mrf.mxu1 }
  0xda   : > { %v632_v34 = vpack.c.bf16 %v345_v32, %v343_v28  ;;  %v642_v35 = vpack.c.bf16 %v355_v33, %v353_v29 }
  0xdc   : > { %664 = vst [vmem:[%s198_s17 + $0x8] sm:$0xff] %v632_v34  }
  0xdd   : > { %666 = vst [vmem:[%s198_s17 + $0x18] sm:$0xff] %v642_v35  }
  0xe0   : > { %v365_v36 = vpop.f32.mrf.mxu2  ;;  %v375_v37 = vpop.f32.mrf.mxu3 }
  0xe1   : > { %v652_v38 = vpack.c.bf16 %v365_v36, %v363_v30  ;;  %v662_v39 = vpack.c.bf16 %v375_v37, %v373_v31 }
  0xe3   : > { %668 = vst [vmem:[%s198_s17 + $0x28] sm:$0xff] %v652_v38  }
  0xe4   : > { %670 = vst [vmem:[%s198_s17 + $0x38] sm:$0xff] %v662_v39  }
  0xe5   : > { %859 = shalt.err (!%p856_p0)
}
  0xe6   : > { %s923_s30 = smov 64   ;;  %s924_s5 = smov 4  }
  0xe7   : > { %701 = dma.vmem_to_hbm [thread:$0]  (%p1022_p5), %s426_s6, 1024, %s428_s15, %s411_s12, %s923_s30, %s923_s30, %s924_s5  }
  0xe8 PF: > { %s442_s7 = sand.u32 1, %s898_s9   ;;  %p712_p3 = pnand %p529_p11, %p989_p6 }
  0xe9   : > { %s443_s3 = scalar_lea.sflag [#allocation4], %s442_s7 }
  0xea   : > { %p713_p7 = pneg %p712_p3 }
  0xec   : > { %893 = dma.done.wait (%p713_p7), %s443_s3, 1024  }
  0xed   : > { %895 = vsyncadd (%p713_p7), %s443_s3, 4294966272  ;;  %s19_s14 = sadd.s32 1, %s918_s14   ;;  %s1119_s9 = smov %s902_s10 }
  0xee   : > { %p16_p9 = scmp.ge.s32.totalorder %s19_s14, 4   ;;  %s1120_s10 = smov %s906_s11 }
  0xef   : > { %s1121_s11 = smov %s1031_s8  ;;  %s1122_s12 = smov %s914_s13 }
  0xf0   : > { %s1123_s13 = smov %s1125_s29  ;;  %18 = sbr.rel (!%p16_p9) target bundleno = 7 (0x7), region = 77 }
  0xf5   :  { %449 = vsyncpa [#allocation3], 1 }
  0xf6   :  { %451 = vsyncpa [#allocation3 + $0x1], 1 }
  0xf7   :  { %452 = vsyncpa [#allocation6], 1 }
  0xf8   :  { %453 = vsyncpa [#allocation4], 1 }
  0xf9   :  { %455 = vsyncpa [#allocation4 + $0x1], 1 }

</bundles_post_ra>
